<compile_context>
chip_gen: v7x
topology: tpu7x:2x2x1
jax: 0.10.0
libtpu: 0.0.40
codegen_flags: <defaults>
</compile_context>

<pallas_src>
import functools

import jax
import jax.numpy as jnp
from jax.experimental import pallas as pl
from jax.experimental.pallas import tpu as pltpu

NEG_SLOPE = 0.2
MASK_BIG = 1e30
VMEM_LIMIT = 32 * 1024 * 1024  # safe on v5e/v6e/v7x (v7x has 64 MiB physical)


def _round_up(v, m):
    return ((v + m - 1) // m) * m


# ---------------------------------------------------------------------------
# Kernel 1: all layers fused (small graphs).
# ---------------------------------------------------------------------------
def _gat_fused_layers_kernel(x_ref, w_ref, b_ref, adjb_ref, out_ref, x_sc):
    layer = pl.program_id(0)
    fp = out_ref.shape[1]                            # padded feature width

    @pl.when(layer == 0)
    def _():
        x_sc[...] = x_ref[...]                       # load activations once

    x_bf = x_sc[...].astype(jnp.bfloat16)
    w_aug = w_ref[0]                                 # (Fp, Fp + 128), bf16
    # One fused MXU matmul: [ h | e_src | e_dst ] = x @ [ W | W a_s | W a_d ]
    h_aug = jnp.dot(x_bf, w_aug, preferred_element_type=jnp.float32)
    h = h_aug[:, :fp]
    e_src = h_aug[:, fp:fp + 1]                      # (Np, 1)
    e_dst = h_aug[:, fp + 1:fp + 2]                  # (Np, 1)

    s = e_dst + jnp.swapaxes(e_src, 0, 1)            # s[i,j] = e_dst[i]+e_src[j]
    s = jnp.maximum(s, NEG_SLOPE * s)                # leaky relu (no select)
    s = s + adjb_ref[...].astype(jnp.float32)        # additive -1e30 edge mask

    m = jnp.max(s, axis=-1, keepdims=True)
    p = jnp.exp(s - m)                               # non-edges underflow to 0
    denom = jnp.sum(p, axis=-1, keepdims=True)
    alpha = p * pl.reciprocal(denom, approx=True)    # EUP, nearly free

    out = jnp.dot(alpha.astype(jnp.bfloat16), h.astype(jnp.bfloat16),
                  preferred_element_type=jnp.float32)
    out = jnp.maximum(out + b_ref[0], 0.0)

    x_sc[...] = out                                  # feed next layer

    @pl.when(layer == pl.num_programs(0) - 1)
    def _():
        out_ref[...] = out                           # lane-dense padded output


def _fused_call(x_pad, adj_bias, w_aug_stack, bias_stack):
    npad, fpad = x_pad.shape
    n_layers = w_aug_stack.shape[0]
    return pl.pallas_call(
        _gat_fused_layers_kernel,
        out_shape=jax.ShapeDtypeStruct((npad, fpad), jnp.float32),
        grid_spec=pltpu.PrefetchScalarGridSpec(
            num_scalar_prefetch=0,
            grid=(n_layers,),
            in_specs=[
                pl.BlockSpec((npad, fpad), lambda l: (0, 0)),            # x (once)
                pl.BlockSpec((1, fpad, fpad + 128), lambda l: (l, 0, 0)),  # weights
                pl.BlockSpec((1, 1, fpad), lambda l: (l, 0, 0)),         # bias
                pl.BlockSpec((npad, npad), lambda l: (0, 0)),            # adj (once)
            ],
            out_specs=pl.BlockSpec((npad, fpad), lambda l: (0, 0)),
            scratch_shapes=[pltpu.VMEM((npad, fpad), jnp.float32)],
        ),
        compiler_params=pltpu.CompilerParams(
            dimension_semantics=("arbitrary",),
            vmem_limit_bytes=VMEM_LIMIT),
    )(x_pad, w_aug_stack, bias_stack, adj_bias)


# ---------------------------------------------------------------------------
# Kernel 2: single GAT layer, flash-style tiled with online softmax.
# ---------------------------------------------------------------------------
def _gat_layer_tiled_kernel(x_dst_ref, x_src_ref, w_ref, b_ref, adjb_ref,
                            out_ref, e_dst_sc, m_sc, l_sc, acc_sc):
    k = pl.program_id(1)
    fp = out_ref.shape[1]
    w_aug = w_ref[...]                               # (Fp, Fp + 128), bf16

    @pl.when(k == 0)
    def _():
        # Project destination rows once per row tile (only e_dst is needed).
        hd_aug = jnp.dot(x_dst_ref[...].astype(jnp.bfloat16), w_aug,
                         preferred_element_type=jnp.float32)
        e_dst_sc[...] = hd_aug[:, fp + 1:fp + 2]
        m_sc[...] = jnp.full(m_sc.shape, -jnp.inf, jnp.float32)
        l_sc[...] = jnp.zeros(l_sc.shape, jnp.float32)
        acc_sc[...] = jnp.zeros(acc_sc.shape, jnp.float32)

    # Project this tile of source nodes: h_src, e_src in one matmul.
    hs_aug = jnp.dot(x_src_ref[...].astype(jnp.bfloat16), w_aug,
                     preferred_element_type=jnp.float32)      # (tk, Fp + 128)
    h_src = hs_aug[:, :fp]
    e_src = jnp.swapaxes(hs_aug[:, fp:fp + 1], 0, 1)           # (1, tk)

    s = e_dst_sc[...] + e_src                                  # (tq, tk)
    s = jnp.maximum(s, NEG_SLOPE * s)                          # leaky relu
    s = s + adjb_ref[...].astype(jnp.float32)                  # additive mask

    m_new = jnp.maximum(m_sc[...], jnp.max(s, axis=-1, keepdims=True))
    scale = jnp.exp(m_sc[...] - m_new)
    p = jnp.exp(s - m_new)
    l_sc[...] = scale * l_sc[...] + jnp.sum(p, axis=-1, keepdims=True)
    acc_sc[...] = scale * acc_sc[...] + jnp.dot(
        p.astype(jnp.bfloat16), h_src.astype(jnp.bfloat16),
        preferred_element_type=jnp.float32)
    m_sc[...] = m_new

    @pl.when(k == pl.num_programs(1) - 1)
    def _():
        out = acc_sc[...] * pl.reciprocal(l_sc[...], approx=True) + b_ref[...]
        out_ref[...] = jnp.maximum(out, 0.0)


def _tiled_layer_call(x_pad, adj_bias, w_aug, bias_pad, tq, tk):
    npad, fpad = x_pad.shape
    assert npad % tq == 0 and npad % tk == 0
    grid = (npad // tq, npad // tk)
    return pl.pallas_call(
        _gat_layer_tiled_kernel,
        out_shape=jax.ShapeDtypeStruct((npad, fpad), jnp.float32),
        grid_spec=pltpu.PrefetchScalarGridSpec(
            num_scalar_prefetch=0,
            grid=grid,
            in_specs=[
                pl.BlockSpec((tq, fpad), lambda i, k: (i, 0)),          # dst rows
                pl.BlockSpec((tk, fpad), lambda i, k: (k, 0)),          # src rows
                pl.BlockSpec((fpad, fpad + 128), lambda i, k: (0, 0)),  # w_aug
                pl.BlockSpec((1, fpad), lambda i, k: (0, 0)),           # bias
                pl.BlockSpec((tq, tk), lambda i, k: (i, k)),            # adj tile
            ],
            out_specs=pl.BlockSpec((tq, fpad), lambda i, k: (i, 0)),
            scratch_shapes=[
                pltpu.VMEM((tq, 1), jnp.float32),      # e_dst
                pltpu.VMEM((tq, 1), jnp.float32),      # running max
                pltpu.VMEM((tq, 1), jnp.float32),      # running denominator
                pltpu.VMEM((tq, fpad), jnp.float32),   # unnormalized output
            ],
        ),
        compiler_params=pltpu.CompilerParams(
            dimension_semantics=("parallel", "arbitrary"),
            vmem_limit_bytes=VMEM_LIMIT),
    )(x_pad, x_pad, w_aug, bias_pad, adj_bias)


# ---------------------------------------------------------------------------
# Parameter / input preparation (plain JAX, outside the kernels).
# ---------------------------------------------------------------------------
def init_encoder_params(key, input_channels, hidden_channels, output_channels,
                        n_layers):
    """Deterministic (key-seeded) parameter init mirroring the module shapes."""
    dims = ([input_channels] + [hidden_channels] * (n_layers - 1)
            + [output_channels])
    params = []
    for li in range(n_layers):
        f_in, f_out = dims[li], dims[li + 1]
        key, k_w, k_as, k_ad = jax.random.split(key, 4)
        scale = 1.0 / jnp.sqrt(jnp.float32(f_in))
        w = jax.random.normal(k_w, (f_in, f_out), jnp.float32) * scale
        a_src = jax.random.normal(k_as, (f_out, 1), jnp.float32) * 0.1
        a_dst = jax.random.normal(k_ad, (f_out, 1), jnp.float32) * 0.1
        bias = jnp.zeros((1, f_out), jnp.float32)
        params.append((w, a_src, a_dst, bias))
    return params


def pack_params(params, fpad):
    """Fold attention vectors into the feature matmul, pad lane-dense, cast
    the MXU operand to bf16:  w_aug = [ W | W@a_src | W@a_dst ]."""
    w_augs, biases = [], []
    for (w, a_src, a_dst, bias) in params:
        f_in, f_out = w.shape
        w_aug = jnp.zeros((fpad, fpad + 128), jnp.float32)
        w_aug = w_aug.at[:f_in, :f_out].set(w)
        w_aug = w_aug.at[:f_in, fpad].set((w @ a_src)[:, 0])
        w_aug = w_aug.at[:f_in, fpad + 1].set((w @ a_dst)[:, 0])
        b = jnp.zeros((1, fpad), jnp.float32).at[:, :f_out].set(bias)
        w_augs.append(w_aug.astype(jnp.bfloat16))
        biases.append(b)
    return jnp.stack(w_augs, axis=0), jnp.stack(biases, axis=0)


def build_adj(edge_index, num_nodes, num_nodes_pad):
    """edge_index: (2, E) int32, row 0 = src, row 1 = dst (PyG convention).
    Returns (padded additive bias in bf16 for the kernels,
             unpadded 0/1 adjacency in f32 for the reference)."""
    # TODO(synk): for graphs too large for a dense NxN adjacency, a CSR /
    # edge-list path with scalar-prefetched neighbour offsets would be needed.
    src, dst = edge_index[0], edge_index[1]
    adj = jnp.zeros((num_nodes_pad, num_nodes_pad), jnp.float32)
    adj = adj.at[dst, src].set(1.0)
    idx = jnp.arange(num_nodes)
    adj = adj.at[idx, idx].set(1.0)                  # self-loops on real nodes
    adj_bias = ((adj - 1.0) * MASK_BIG).astype(jnp.bfloat16)
    return adj_bias, adj[:num_nodes, :num_nodes]


def pad_features(x, npad, fpad):
    n, f = x.shape
    return jnp.zeros((npad, fpad), jnp.float32).at[:n, :f].set(x)


# ---------------------------------------------------------------------------
# Top-level forward passes.
# ---------------------------------------------------------------------------
@functools.partial(jax.jit, static_argnames=("num_nodes", "out_channels",
                                             "batch_size", "framework"))
def encoder_forward_fused(x_pad, adj_bias, w_aug_stack, bias_stack, *,
                          num_nodes, out_channels, batch_size, framework):
    out = _fused_call(x_pad, adj_bias, w_aug_stack, bias_stack)
    out = out[:num_nodes, :out_channels]
    return out if framework else out[:batch_size]


@functools.partial(jax.jit, static_argnames=("num_nodes", "out_channels",
                                             "batch_size", "framework",
                                             "tq", "tk"))
def encoder_forward_tiled(x_pad, adj_bias, w_aug_stack, bias_stack, *,
                          num_nodes, out_channels, batch_size, framework,
                          tq=128, tk=128):
    n_layers = w_aug_stack.shape[0]
    for l in range(n_layers):
        x_pad = _tiled_layer_call(x_pad, adj_bias, w_aug_stack[l],
                                  bias_stack[l], tq, tk)
    out = x_pad[:num_nodes, :out_channels]
    return out if framework else out[:batch_size]


def encoder_reference(params, x, adj01, batch_size, framework):
    """Pure-JAX f32 reference with PyG GATConv semantics."""
    for (w, a_src, a_dst, bias) in params:
        h = x @ w
        e_src = h @ a_src
        e_dst = h @ a_dst
        s = e_dst + e_src.T
        s = jnp.where(s > 0, s, NEG_SLOPE * s)
        s = jnp.where(adj01 > 0, s, -jnp.inf)
        alpha = jax.nn.softmax(s, axis=-1)
        x = jnp.maximum(alpha @ h + bias, 0.0)
    return x if framework else x[:batch_size]


if __name__ == "__main__":
    key = jax.random.PRNGKey(0)

    # Small, module-consistent shapes.
    num_nodes = 16
    input_channels = 8
    hidden_channels = 16
    output_channels = 8
    n_layers = 3
    batch_size = 4
    num_edges = 32

    key, k_x, k_src, k_dst, k_p = jax.random.split(key, 5)
    x = jax.random.normal(k_x, (num_nodes, input_channels), jnp.float32)
    edge_src = jax.random.randint(k_src, (num_edges,), 0, num_nodes, jnp.int32)
    edge_dst = jax.random.randint(k_dst, (num_edges,), 0, num_nodes, jnp.int32)
    edge_index = jnp.stack([edge_src, edge_dst], axis=0)  # (2, E)

    params = init_encoder_params(k_p, input_channels, hidden_channels,
                                 output_channels, n_layers)

    # Pad everything lane-dense.
    fpad = _round_up(max(input_channels, hidden_channels, output_channels), 128)
    tq = tk = 128
    npad = _round_up(num_nodes, max(tq, tk))

    w_aug_stack, bias_stack = pack_params(params, fpad)
    adj_bias, adj01 = build_adj(edge_index, num_nodes, npad)
    x_pad = pad_features(x, npad, fpad)

    # Full-graph outputs (framework=True) from both kernel paths.
    out_fused = encoder_forward_fused(
        x_pad, adj_bias, w_aug_stack, bias_stack,
        num_nodes=num_nodes, out_channels=output_channels,
        batch_size=batch_size, framework=True)
    out_tiled = encoder_forward_tiled(
        x_pad, adj_bias, w_aug_stack, bias_stack,
        num_nodes=num_nodes, out_channels=output_channels,
        batch_size=batch_size, framework=True, tq=tq, tk=tk)
    out_fused, out_tiled = jax.block_until_ready((out_fused, out_tiled))
    assert out_fused.shape == (num_nodes, output_channels)
    assert out_tiled.shape == (num_nodes, output_channels)

    # Correctness check against the f32 reference (loose: kernels use bf16 MXU
    # operands and approximate reciprocal).
    ref = jax.block_until_ready(
        encoder_reference(params, x, adj01, batch_size, True))
    scale = float(jnp.max(jnp.abs(ref))) + 1e-6
    err_fused = float(jnp.max(jnp.abs(out_fused - ref))) / scale
    err_tiled = float(jnp.max(jnp.abs(out_tiled - ref))) / scale
    assert err_fused < 0.1, f"fused path mismatch: rel err {err_fused}"
    assert err_tiled < 0.1, f"tiled path mismatch: rel err {err_tiled}"

    # framework=False path returns only the first batch_size rows.
    out_batch = encoder_forward_fused(
        x_pad, adj_bias, w_aug_stack, bias_stack,
        num_nodes=num_nodes, out_channels=output_channels,
        batch_size=batch_size, framework=False)
    out_batch = jax.block_until_ready(out_batch)
    assert out_batch.shape == (batch_size, output_channels)

    print("KERNEL_OK")
</pallas_src>

<mosaic_0001>
module attributes {stable_mosaic.version = 11 : i64} {
  func.func @_gat_fused_layers_kernel(%arg0: i32, %arg1: memref<128x128xf32, #tpu.memory_space<vmem>>, %arg2: memref<1x128x256xbf16, #tpu.memory_space<vmem>>, %arg3: memref<1x1x128xf32, #tpu.memory_space<vmem>>, %arg4: memref<128x128xbf16, #tpu.memory_space<vmem>>, %arg5: memref<128x128xf32, #tpu.memory_space<vmem>>, %arg6: memref<128x128xf32, #tpu.memory_space<vmem>>) attributes {dimension_semantics = [#tpu.dimension_semantics<arbitrary>], iteration_bounds = array<i64: 3>, scalar_prefetch = 0 : i64, scratch_operands = 1 : i64, tpu.core_type = #tpu.core_type<tc>, window_params = [{pipeline_mode = #tpu.pipeline_mode<synchronous>, transform_indices = @transform_0, window_bounds = array<i64: 128, 128>}, {transform_indices = @transform_1, window_bounds = array<i64: 1, 128, 256>}, {transform_indices = @transform_2, window_bounds = array<i64: 1, 1, 128>}, {pipeline_mode = #tpu.pipeline_mode<synchronous>, transform_indices = @transform_3, window_bounds = array<i64: 128, 128>}, {pipeline_mode = #tpu.pipeline_mode<synchronous>, transform_indices = @transform_4, window_bounds = array<i64: 128, 128>}]} {
    %c0_i32 = arith.constant 0 : i32
    %0 = arith.cmpi eq, %arg0, %c0_i32 : i32
    %1 = arith.extui %0 : i1 to i32
    %c0_i32_0 = arith.constant 0 : i32
    %2 = arith.cmpi ne, %1, %c0_i32_0 : i32
    scf.if %2 {
      %c0_18 = arith.constant 0 : index
      %c0_19 = arith.constant 0 : index
      %44 = vector.load %arg1[%c0_18, %c0_19] : memref<128x128xf32, #tpu.memory_space<vmem>>, vector<128x128xf32>
      %c0_20 = arith.constant 0 : index
      %c0_21 = arith.constant 0 : index
      %45 = vector.load %arg6[%c0_20, %c0_21] : memref<128x128xf32, #tpu.memory_space<vmem>>, vector<128x128xf32>
      tpu.vector_store %arg6[%c0_20, %c0_21], %44 {strides = array<i32>} : memref<128x128xf32, #tpu.memory_space<vmem>>, vector<128x128xf32>,
    } else {
    }
    %c0 = arith.constant 0 : index
    %c0_1 = arith.constant 0 : index
    %3 = vector.load %arg6[%c0, %c0_1] : memref<128x128xf32, #tpu.memory_space<vmem>>, vector<128x128xf32>
    %4 = arith.truncf %3 : vector<128x128xf32> to vector<128x128xbf16>
    %c0_2 = arith.constant 0 : index
    %c0_3 = arith.constant 0 : index
    %c0_4 = arith.constant 0 : index
    %5 = vector.load %arg2[%c0_2, %c0_3, %c0_4] : memref<1x128x256xbf16, #tpu.memory_space<vmem>>, vector<1x128x256xbf16>
    %6 = vector.shape_cast %5 : vector<1x128x256xbf16> to vector<128x256xbf16>
    %cst = arith.constant dense<0.000000e+00> : vector<128x256xf32>
    %7 = tpu.matmul %4, %6, %cst {dimension_numbers = #tpu.dot_dimension_numbers<[1], [0], [0], [1], [0, 0, 1, 1], [], []>} : vector<128x128xbf16>, vector<128x256xbf16>, vector<128x256xf32> -> vector<128x256xf32>
    %8 = vector.extract_strided_slice %7 {offsets = [0, 0], sizes = [128, 128], strides = [1, 1]} : vector<128x256xf32> to vector<128x128xf32>
    %9 = vector.extract_strided_slice %7 {offsets = [0, 128], sizes = [128, 1], strides = [1, 1]} : vector<128x256xf32> to vector<128x1xf32>
    %10 = vector.extract_strided_slice %7 {offsets = [0, 129], sizes = [128, 1], strides = [1, 1]} : vector<128x256xf32> to vector<128x1xf32>
    %11 = tpu.transpose %9, [1, 0] : vector<128x1xf32> -> vector<1x128xf32>
    %12 = vector.broadcast %10 : vector<128x1xf32> to vector<128x128xf32>
    %13 = vector.broadcast %11 : vector<1x128xf32> to vector<128x128xf32>
    %14 = arith.addf %12, %13 : vector<128x128xf32>
    %cst_5 = arith.constant 2.000000e-01 : f32
    %15 = vector.broadcast %cst_5 : f32 to vector<128x128xf32>
    %16 = arith.mulf %15, %14 : vector<128x128xf32>
    %17 = arith.maximumf %14, %16 : vector<128x128xf32>
    %c0_6 = arith.constant 0 : index
    %c0_7 = arith.constant 0 : index
    %18 = vector.load %arg4[%c0_6, %c0_7] : memref<128x128xbf16, #tpu.memory_space<vmem>>, vector<128x128xbf16>
    %19 = arith.extf %18 : vector<128x128xbf16> to vector<128x128xf32>
    %20 = arith.addf %17, %19 : vector<128x128xf32>
    %cst_8 = arith.constant dense<0xFF800000> : vector<128xf32>
    %21 = vector.multi_reduction <maximumf>, %20, %cst_8 [1] : vector<128x128xf32> to vector<128xf32>
    %22 = vector.shape_cast %21 : vector<128xf32> to vector<128x1xf32>
    %23 = vector.broadcast %22 : vector<128x1xf32> to vector<128x128xf32>
    %24 = arith.subf %20, %23 : vector<128x128xf32>
    %25 = math.exp %24 : vector<128x128xf32>
    %cst_9 = arith.constant dense<0.000000e+00> : vector<128xf32>
    %26 = vector.multi_reduction <add>, %25, %cst_9 [1] : vector<128x128xf32> to vector<128xf32>
    %27 = vector.shape_cast %26 : vector<128xf32> to vector<128x1xf32>
    %28 = tpu.reciprocal %27 {approx = true} : vector<128x1xf32> -> vector<128x1xf32>
    %29 = vector.broadcast %28 : vector<128x1xf32> to vector<128x128xf32>
    %30 = arith.mulf %25, %29 : vector<128x128xf32>
    %31 = arith.truncf %30 : vector<128x128xf32> to vector<128x128xbf16>
    %32 = arith.truncf %8 : vector<128x128xf32> to vector<128x128xbf16>
    %cst_10 = arith.constant dense<0.000000e+00> : vector<128x128xf32>
    %33 = tpu.matmul %31, %32, %cst_10 {dimension_numbers = #tpu.dot_dimension_numbers<[1], [0], [0], [1], [0, 0, 1, 1], [], []>} : vector<128x128xbf16>, vector<128x128xbf16>, vector<128x128xf32> -> vector<128x128xf32>
    %c0_11 = arith.constant 0 : index
    %c0_12 = arith.constant 0 : index
    %c0_13 = arith.constant 0 : index
    %34 = vector.load %arg3[%c0_11, %c0_12, %c0_13] : memref<1x1x128xf32, #tpu.memory_space<vmem>>, vector<1x1x128xf32>
    %35 = vector.shape_cast %34 : vector<1x1x128xf32> to vector<1x128xf32>
    %36 = vector.broadcast %35 : vector<1x128xf32> to vector<128x128xf32>
    %37 = arith.addf %33, %36 : vector<128x128xf32>
    %cst_14 = arith.constant 0.000000e+00 : f32
    %38 = vector.broadcast %cst_14 : f32 to vector<128x128xf32>
    %39 = arith.maximumf %37, %38 : vector<128x128xf32>
    %c0_15 = arith.constant 0 : index
    %c0_16 = arith.constant 0 : index
    %40 = vector.load %arg6[%c0_15, %c0_16] : memref<128x128xf32, #tpu.memory_space<vmem>>, vector<128x128xf32>
    tpu.vector_store %arg6[%c0_15, %c0_16], %39 {strides = array<i32>} : memref<128x128xf32, #tpu.memory_space<vmem>>, vector<128x128xf32>,
    %c2_i32 = arith.constant 2 : i32
    %41 = arith.cmpi eq, %arg0, %c2_i32 : i32
    %42 = arith.extui %41 : i1 to i32
    %c0_i32_17 = arith.constant 0 : i32
    %43 = arith.cmpi ne, %42, %c0_i32_17 : i32
    scf.if %43 {
      %c0_18 = arith.constant 0 : index
      %c0_19 = arith.constant 0 : index
      %44 = vector.load %arg5[%c0_18, %c0_19] : memref<128x128xf32, #tpu.memory_space<vmem>>, vector<128x128xf32>
      tpu.vector_store %arg5[%c0_18, %c0_19], %39 {strides = array<i32>} : memref<128x128xf32, #tpu.memory_space<vmem>>, vector<128x128xf32>,
    } else {
    }
    return
  }
  func.func @transform_0(%arg0: i32) -> (i32, i32) {
    %c0_i32 = arith.constant 0 : i32
    %c0_i32_0 = arith.constant 0 : i32
    %c0_i32_1 = arith.constant 0 : i32
    return %c0_i32, %c0_i32_0 : i32, i32
  }
  func.func @transform_1(%arg0: i32) -> (i32, i32, i32) {
    %c0_i32 = arith.constant 0 : i32
    %c0_i32_0 = arith.constant 0 : i32
    %c0_i32_1 = arith.constant 0 : i32
    return %arg0, %c0_i32, %c0_i32_0 : i32, i32, i32
  }
  func.func @transform_2(%arg0: i32) -> (i32, i32, i32) {
    %c0_i32 = arith.constant 0 : i32
    %c0_i32_0 = arith.constant 0 : i32
    %c0_i32_1 = arith.constant 0 : i32
    return %arg0, %c0_i32, %c0_i32_0 : i32, i32, i32
  }
  func.func @transform_3(%arg0: i32) -> (i32, i32) {
    %c0_i32 = arith.constant 0 : i32
    %c0_i32_0 = arith.constant 0 : i32
    %c0_i32_1 = arith.constant 0 : i32
    return %c0_i32, %c0_i32_0 : i32, i32
  }
  func.func @transform_4(%arg0: i32) -> (i32, i32) {
    %c0_i32 = arith.constant 0 : i32
    %c0_i32_0 = arith.constant 0 : i32
    %c0_i32_1 = arith.constant 0 : i32
    return %c0_i32, %c0_i32_0 : i32, i32
  }
}

</mosaic_0001>

<bundles_post_ra>
// kernel: encoder_forward_fused.1
= control target key start
LH: loop header
LB: loop body
LE: loop exit
PB: predicated region body
PF: predicated region fallthrough
CT: control target
= control target key end

     0   :  { %9 = vsyncpa [#allocation4], 0  ;;  %s2018_s0 = inlined_call_operand.hbm [shape: f32[128,128], index: 0, kind: input, shape index: {}]   ;;  %s2019_s1 = inlined_call_operand.hbm [shape: bf16[3,128,256], index: 1, kind: input, shape index: {}]   ;;  %s2020_s2 = inlined_call_operand.vmem [shape: f32[3,1,128], index: 2, kind: input, shape index: {}]   ;;  %s2021_s3 = inlined_call_operand.hbm [shape: bf16[128,128], index: 3, kind: input, shape index: {}]   ;;  %s2022_s4 = inlined_call_operand.vmem [shape: f32[128,128], index: 4, kind: output, shape index: {}]  }
   0x1   :  { %10 = vsyncpa [#allocation6], 0 }
   0x2   :  { %12 = vsyncpa [#allocation6 + $0x1], 0  ;;  %s1554_s15 = smov 0   ;;  %s1556_s16 = smov 0  }
   0x3   :  { %s1558_s17 = smov 0   ;;  %s1560_s18 = smov 0  }
   0x4 LB: > { %s1573_s19 = sadd.s32 4294967295, %s1518_s18   ;;  %s1576_s20 = sadd.s32 1, %s1518_s18   ;;  %s1518_s18 = sphi %s1560_s18, %s2043_s18   ;;  %s1514_s17 = sphi %s1558_s17, %s2042_s17   ;;  %s1510_s16 = sphi %s1556_s16, %s2041_s16   ;;  %s1506_s15 = sphi %s1554_s15, %s2040_s15  }
   0x5   : > { %s43_s21 = ssub.s32 %s1518_s18, %s1576_s20  ;;  %s46_s22 = sadd.s32 1, %s1514_s17 }
   0x6   : > { %p44_p0 = scmp.eq.s32.totalorder %s43_s21, 0  ;;  %p53_p1 = scmp.ne.s32.totalorder %s1514_s17, %s1510_s16 }
   0x7   : > { %p54_p2 = scmp.eq.s32.totalorder %s1518_s18, 0  ;;  %p59_p3 = scmp.ne.s32.totalorder %s1510_s16, %s1506_s15 }
   0x8   : > { %s1586_s23 = scalar_select %p44_p0, %s1514_s17, %s46_s22  }
   0x9   : > { %p1588_p4 = por %p54_p2, %p53_p1  ;;  %p2023_p5 = scmp.eq.s32.totalorder %s1573_s19, 0 }
   0xa   : > { %p1114_p6 = scmp.ge.s32.totalorder %s1518_s18, 1  ;;  %p138_p7 = scmp.lt.s32.totalorder %s1518_s18, 4 }
   0xb   : > { %p1597_p8 = por %p2023_p5, %p59_p3  ;;  %s1520_s27 = smov [#allocation7]  }
   0xc   : > { %p1602_p10 = pnand %p1114_p6, %p138_p7  ;;  %s163_s28 = sshll.u32 %s1520_s27, 4  ;;  %s164_s28 = int_to_ptr.vmem [resolvable:$true] %s163_s28 }
   0xd   : > { %s2028_s25 = scalar_select %p1597_p8, 1, 0 }
   0xe   : > { %s2029_s26 = scalar_select %p1602_p10, 1, 0 }
   0xf   : > { %p1244_p11 = pneg %p1602_p10  ;;  %p1257_p13 = scmp.lt.s32.totalorder %s1518_s18, 3 }
  0x10   : > { %s1390_s7 = scalar_lea.hbm %s2021_s3, 1024 }
  0x11   : > { %p1610_p12 = pnand %p1244_p11, %p2023_p5  ;;  %p1617_p0 = pnand %p1257_p13, %p1588_p4 }
  0x12   : > { %p1391_p1 = scmp.ne.s32.totalorder %s2021_s3, %s1390_s7  ;;  %p1397_p4 = scmp.lt.u32.totalorder %s1390_s7, %s2021_s3 }
  0x13   : > { %s2031_s30 = scalar_select %p1617_p0, 1, 0 }
  0x14   : > { %p1392_p2 = pneg %p1610_p12 }
  0x16   : > { %p1393_p3 = pnand %p1392_p2, %p1391_p1 }
  0x18   : > { %p1394_p6 = pneg %p1393_p3 }
  0x1a   : > { %p1399_p7 = pnand %p1397_p4, %p1394_p6 }
  0x1c   : > { %1402 = shalt.err (!%p1399_p7)
}
  0x1d   : > { %s1403_s12 = scalar_lea.vmem %s164_s28, 1024  ;;  %p1411_p5 = scmp.lt.s32.totalorder %s164_s28, %s164_s28 }
  0x1e   : > { %p1404_p11 = scmp.ne.s32.totalorder %s164_s28, %s1403_s12  ;;  %p1412_p8 = scmp.lt.s32.totalorder %s1403_s12, %s1403_s12 }
  0x20   : > { %p1406_p13 = pnand %p1404_p11, %p1392_p2  ;;  %p1413_p10 = por %p1412_p8, %p1411_p5 }
  0x22   : > { %p1407_p9 = pneg %p1406_p13 }
  0x24   : > { %p1414_p0 = pnand %p1413_p10, %p1407_p9 }
  0x26   : > { %1417 = shalt.err (!%p1414_p0)
}
  0x27   : > { %s1521_s13 = smov 64   ;;  %s1522_s14 = smov 4  }
  0x28   : > { %1250 = dma.hbm_to_vmem [thread:$0]  (!%p1610_p12), %s2021_s3, 1024, %s164_s28, [#allocation6], %s1521_s13, %s1521_s13, %s1522_s14  }
  0x29   : > { %s1523_s22 = smov [#allocation3]   ;;  %s1418_s6 = scalar_lea.hbm %s2018_s0, 2048 }
  0x2a   : > { %s150_s24 = sshll.u32 %s1523_s22, 4  ;;  %p1419_p5 = scmp.ne.s32.totalorder %s2018_s0, %s1418_s6  ;;  %s151_s24 = int_to_ptr.vmem [resolvable:$true] %s150_s24 }
  0x2b   : > { %p1425_p10 = scmp.lt.u32.totalorder %s1418_s6, %s2018_s0 }
  0x2c   : > { %p1421_p8 = pnand %p1419_p5, %p1392_p2 }
  0x2e   : > { %p1422_p9 = pneg %p1421_p8 }
  0x30   : > { %p1427_p0 = pnand %p1425_p10, %p1422_p9 }
  0x32   : > { %1430 = shalt.err (!%p1427_p0)
}
  0x33   : > { %s1431_s28 = scalar_lea.vmem %s151_s24, 2048  ;;  %p1439_p4 = scmp.lt.s32.totalorder %s151_s24, %s151_s24 }
  0x34   : > { %p1432_p1 = scmp.ne.s32.totalorder %s151_s24, %s1431_s28  ;;  %p1440_p7 = scmp.lt.s32.totalorder %s1431_s28, %s1431_s28 }
  0x36   : > { %p1434_p3 = pnand %p1432_p1, %p1392_p2  ;;  %p1441_p11 = por %p1440_p7, %p1439_p4 }
  0x38   : > { %p1435_p6 = pneg %p1434_p3 }
  0x3a   : > { %p1442_p13 = pnand %p1441_p11, %p1435_p6 }
  0x3c   : > { %1445 = shalt.err (!%p1442_p13)
}
  0x3d   : > { %s1524_s11 = smov 128   ;;  %s1525_s12 = smov 8  }
  0x3e   : > { %1247 = dma.hbm_to_vmem [thread:$0]  (!%p1610_p12), %s2018_s0, 2048, %s151_s24, [#allocation4], %s1524_s11, %s1524_s11, %s1525_s12  }
  0x3f   : > { %s177_s15 = sand.u32 1, %s1518_s18   ;;  %s179_s21 = sand.u32 1, %s1514_s17  }
  0x40   : > { %s1118_s22 = sshll.u32 %s179_s21, 7  ;;  %s1146_s27 = sshll.u32 %s1518_s18, 11 }
  0x41   : > { %s1672_s7 = scalar_lea.hbm %s2019_s1, %s1146_s27  ;;  %s181_s29 = scalar_lea.vmem [#allocation5], %s1118_s22 }
  0x42   : > { %s188_s8 = sshll.u32 %s181_s29, 4  ;;  %s1676_s9 = scalar_lea.sflag [#allocation6], %s177_s15  ;;  %s1674_s8 = int_to_ptr.vmem [resolvable:$true] %s188_s8 }
  0x43   : > { %s1446_s24 = scalar_lea.hbm %s1672_s7, 2048  ;;  %p2032_p2 = scmp.ne.s32.totalorder %s2031_s30, 0 }
  0x44   : > { %p1447_p12 = scmp.ne.s32.totalorder %s1672_s7, %s1446_s24  ;;  %s1451_s28 = scalar_lea.hbm %s2019_s1, 6144 }
  0x45   : > { %p1448_p5 = pneg %p2032_p2  ;;  %p1452_p10 = scmp.lt.u32.totalorder %s1672_s7, %s2019_s1 }
  0x46   : > { %p1453_p0 = scmp.lt.u32.totalorder %s1451_s28, %s1446_s24  ;;  %p1455_p3 = scmp.lt.u32.totalorder %s1446_s24, %s1672_s7 }
  0x47   : > { %p1449_p8 = pnand %p1448_p5, %p1447_p12 }
  0x48   : > { %p1454_p1 = por %p1453_p0, %p1452_p10 }
  0x49   : > { %p1450_p9 = pneg %p1449_p8 }
  0x4a   : > { %p1456_p6 = por %p1455_p3, %p1454_p1 }
  0x4c   : > { %p1457_p4 = pnand %p1456_p6, %p1450_p9 }
  0x4e   : > { %1460 = shalt.err (!%p1457_p4)
}
  0x4f   : > { %s1461_s15 = scalar_lea.vmem %s1674_s8, 2048  ;;  %s1526_s21 = smov [#allocation5]  }
  0x50   : > { %p1462_p7 = scmp.ne.s32.totalorder %s1674_s8, %s1461_s15  ;;  %s1466_s22 = sshll.u32 %s1526_s21, 4  ;;  %s1467_s22 = int_to_ptr.vmem [resolvable:$false] %s1466_s22 }
  0x51   : > { %s1468_s27 = scalar_lea.vmem %s1467_s22, 4096  ;;  %p1469_p12 = scmp.lt.s32.totalorder %s1674_s8, %s1467_s22 }
  0x52   : > { %p1464_p11 = pnand %p1462_p7, %p1448_p5  ;;  %p1470_p8 = scmp.lt.s32.totalorder %s1468_s27, %s1461_s15 }
  0x54   : > { %p1465_p13 = pneg %p1464_p11  ;;  %p1471_p10 = por %p1470_p8, %p1469_p12 }
  0x56   : > { %p1472_p0 = pnand %p1471_p10, %p1465_p13 }
  0x58   : > { %1475 = shalt.err (!%p1472_p0)
}
  0x59   : > { %1254 = dma.hbm_to_vmem [thread:$0]  (!%p2032_p2), %s1672_s7, 2048, %s1674_s8, %s1676_s9, %s1524_s11, %s1524_s11, %s1525_s12  }
  0x5a   : > { %p2033_p5 = scmp.ne.s32.totalorder %s2029_s26, 0 }
  0x5b   : > { %p2034_p9 = scmp.eq.s32.totalorder (!%p2033_p5), %s1573_s19, 0 }
  0x5c   : > { %206 = sbr.rel (%p2033_p5) target bundleno = 1181 (0x49d), region = 36 }
  0x63   : > { %1493 = dma.done.wait (%p2034_p9), [#allocation4], 2048   ;;  %p2035_p1 = pmov %p2034_p9 }
  0x64   : > { %s212_s30 = sand.u32 1, %s1573_s19   ;;  %s214_s5 = sand.u32 1, %s1510_s16  }
  0x65   : > { %1495 = vsyncadd (%p2035_p1), [#allocation4], 4294965248  ;;  %s1123_s6 = sshll.u32 %s214_s5, 7  ;;  %s213_s29 = scalar_lea.sflag [#allocation6], %s212_s30 }
  0x66   : > { %s1715_s24 = scalar_lea.vmem [#allocation5], %s1123_s6  ;;  %p2036_p3 = scmp.ne.s32.totalorder %s2028_s25, 0 }
  0x68   : > { %1497 = dma.done.wait (%p2036_p3), %s213_s29, 2048  }
  0x69   : > { %1499 = vsyncadd (%p2036_p3), %s213_s29, 4294965248  ;;  %p2037_p2 = pmov %p2035_p1 }
  0x6a   : > { %p2038_p6 = pmov %p2035_p1 }
  0x6b   : > { %1501 = dma.done.wait (%p2037_p2), [#allocation6], 1024  }
  0x6c   : > { %1503 = vsyncadd (%p2038_p6), [#allocation6], 4294966272  ;;  %p243_p4 = scmp.lt.s32.totalorder %s1573_s19, 2  ;;  %p2039_p7 = scmp.ne.s32.totalorder %s1573_s19, 0 }
  0x6d   : > { %v251_v0 = vld [vmem:[#allocation3] sm:$0xff] (!%p2039_p7)  ;;  %v252_v1 = vld [vmem:[#allocation3 + $0x8] sm:$0xff] (!%p2039_p7)  ;;  %v253_v2 = vld [vmem:[#allocation3 + $0x10] sm:$0xff] (!%p2039_p7) }
  0x6e   : > { %s1727_s26 = scalar_select %p243_p4, %s1573_s19, 2 }
  0x6f   : > { %250 = sbr.rel (%p2039_p7) target bundleno = 119 (0x77), region = 52  ;;  %267 = vst [vmem:[#allocation2] sm:$0xff] (!%p2039_p7), %v251_v0  ;;  %268 = vst [vmem:[#allocation2 + $0x8] sm:$0xff] (!%p2039_p7), %v252_v1  ;;  %v254_v3 = vld [vmem:[#allocation3 + $0x18] sm:$0xff] (!%p2039_p7)  ;;  %v255_v4 = vld [vmem:[#allocation3 + $0x20] sm:$0xff] (!%p2039_p7) }
  0x70   : > { %s245_s7 = scalar_lea.vmem %s2020_s2, %s1727_s26  ;;  %269 = vst [vmem:[#allocation2 + $0x10] sm:$0xff] (!%p2039_p7), %v253_v2  ;;  %v256_v5 = vld [vmem:[#allocation3 + $0x28] sm:$0xff] (!%p2039_p7)  ;;  %270 = vst [vmem:[#allocation2 + $0x18] sm:$0xff] (!%p2039_p7), %v254_v3  ;;  %v257_v6 = vld [vmem:[#allocation3 + $0x30] sm:$0xff] (!%p2039_p7) }
  0x71   : > { %271 = vst [vmem:[#allocation2 + $0x20] sm:$0xff] (!%p2039_p7), %v255_v4  ;;  %272 = vst [vmem:[#allocation2 + $0x28] sm:$0xff] (!%p2039_p7), %v256_v5  ;;  %v258_v7 = vld [vmem:[#allocation3 + $0x38] sm:$0xff] (!%p2039_p7)  ;;  %v259_v8 = vld [vmem:[#allocation3 + $0x40] sm:$0xff] (!%p2039_p7) }
  0x72   : > { %273 = vst [vmem:[#allocation2 + $0x30] sm:$0xff] (!%p2039_p7), %v257_v6  ;;  %274 = vst [vmem:[#allocation2 + $0x38] sm:$0xff] (!%p2039_p7), %v258_v7  ;;  %v260_v9 = vld [vmem:[#allocation3 + $0x48] sm:$0xff] (!%p2039_p7)  ;;  %v261_v10 = vld [vmem:[#allocation3 + $0x50] sm:$0xff] (!%p2039_p7) }
  0x73   : > { %275 = vst [vmem:[#allocation2 + $0x40] sm:$0xff] (!%p2039_p7), %v259_v8  ;;  %v262_v11 = vld [vmem:[#allocation3 + $0x58] sm:$0xff] (!%p2039_p7)  ;;  %276 = vst [vmem:[#allocation2 + $0x48] sm:$0xff] (!%p2039_p7), %v260_v9  ;;  %v263_v12 = vld [vmem:[#allocation3 + $0x60] sm:$0xff] (!%p2039_p7) }
  0x74   : > { %277 = vst [vmem:[#allocation2 + $0x50] sm:$0xff] (!%p2039_p7), %v261_v10  ;;  %278 = vst [vmem:[#allocation2 + $0x58] sm:$0xff] (!%p2039_p7), %v262_v11  ;;  %v264_v13 = vld [vmem:[#allocation3 + $0x68] sm:$0xff] (!%p2039_p7)  ;;  %v265_v14 = vld [vmem:[#allocation3 + $0x70] sm:$0xff] (!%p2039_p7) }
  0x75   : > { %279 = vst [vmem:[#allocation2 + $0x60] sm:$0xff] (!%p2039_p7), %v263_v12  ;;  %280 = vst [vmem:[#allocation2 + $0x68] sm:$0xff] (!%p2039_p7), %v264_v13  ;;  %v266_v15 = vld [vmem:[#allocation3 + $0x78] sm:$0xff] (!%p2039_p7) }
  0x76   : > { %281 = vst [vmem:[#allocation2 + $0x70] sm:$0xff] %v265_v14  ;;  %282 = vst [vmem:[#allocation2 + $0x78] sm:$0xff] %v266_v15 }
  0x77 PF: > { %v1302_v16 = vld [vmem:[%s1715_s24 + $0x4] ss:$8 sps:$4 sm:$0xff]   ;;  %v1304_v17 = vld [vmem:[%s1715_s24] ss:$8 sps:$4 sm:$0xff]   ;;  %v1527_v18 = vmov 0   ;;  %v1528_v57 = vmov 1  }
  0x78   : > { %435 = vmatprep.mubr.bf16.mxu0 %v1527_v18  ;;  %403 = vmatprep.subr.bf16.mxu0 %v1302_v16  ;;  %v1305_v19 = vld [vmem:[%s1715_s24 + $0x14] ss:$8 sps:$4 sm:$0xff]   ;;  %v1307_v20 = vld [vmem:[%s1715_s24 + $0x10] ss:$8 sps:$4 sm:$0xff]   ;;  %v1308_v21 = vld [vmem:[%s1715_s24 + $0x24] ss:$8 sps:$4 sm:$0xff]  }
  0x79   : > { %404 = vmatpush1.bf16.msra.mxu0 %v1304_v17  ;;  %v1310_v22 = vld [vmem:[%s1715_s24 + $0x20] ss:$8 sps:$4 sm:$0xff]   ;;  %v1311_v23 = vld [vmem:[%s1715_s24 + $0x34] ss:$8 sps:$4 sm:$0xff]   ;;  %v1313_v24 = vld [vmem:[%s1715_s24 + $0x30] ss:$8 sps:$4 sm:$0xff]   ;;  %1300 = vset.pattern.permute.xlu0 %v1528_v57 }
  0x7a   : > { %405 = vmatprep.subr.bf16.mxu0 %v1305_v19  ;;  %v1314_v25 = vld [vmem:[%s1715_s24 + $0x44] ss:$8 sps:$4 sm:$0xff]   ;;  %v1316_v26 = vld [vmem:[%s1715_s24 + $0x40] ss:$8 sps:$4 sm:$0xff]   ;;  %v1317_v27 = vld [vmem:[%s1715_s24 + $0x54] ss:$8 sps:$4 sm:$0xff]   ;;  %1301 = vset.pattern.permute.xlu1 %v1528_v57 }
  0x7b   : > { %v1319_v28 = vld [vmem:[%s1715_s24 + $0x50] ss:$8 sps:$4 sm:$0xff]   ;;  %v1320_v29 = vld [vmem:[%s1715_s24 + $0x64] ss:$8 sps:$4 sm:$0xff]   ;;  %v1322_v30 = vld [vmem:[%s1715_s24 + $0x60] ss:$8 sps:$4 sm:$0xff]  }
  0x7c   : > { %v1323_v31 = vld [vmem:[%s1715_s24 + $0x74] ss:$8 sps:$4 sm:$0xff]   ;;  %v1325_v32 = vld [vmem:[%s1715_s24 + $0x70] ss:$8 sps:$4 sm:$0xff]   ;;  %v283_v33 = vld [vmem:[#allocation2] sm:$0xff]  ;;  %p1143_p11 = scmp.ne.s32.totalorder %s1573_s19, 2 }
  0x7d   : > { %406 = vmatpush1.bf16.msra.mxu0 %v1307_v20  ;;  %v284_v34 = vld [vmem:[#allocation2 + $0x8] sm:$0xff]  ;;  %v285_v36 = vld [vmem:[#allocation2 + $0x10] sm:$0xff]  ;;  %v286_v37 = vld [vmem:[#allocation2 + $0x18] sm:$0xff] }
  0x7e   : > { %407 = vmatprep.subr.bf16.mxu0 %v1308_v21  ;;  %v299_v35 = vpack.c.bf16 %v284_v34, %v283_v33  ;;  %v300_v38 = vpack.c.bf16 %v286_v37, %v285_v36  ;;  %v287_v39 = vld [vmem:[#allocation2 + $0x20] sm:$0xff]  ;;  %v288_v40 = vld [vmem:[#allocation2 + $0x28] sm:$0xff]  ;;  %v289_v42 = vld [vmem:[#allocation2 + $0x30] sm:$0xff] }
  0x7f   : > { %v301_v41 = vpack.c.bf16 %v288_v40, %v287_v39  ;;  %v290_v43 = vld [vmem:[#allocation2 + $0x38] sm:$0xff]  ;;  %v291_v45 = vld [vmem:[#allocation2 + $0x40] sm:$0xff]  ;;  %v292_v46 = vld [vmem:[#allocation2 + $0x48] sm:$0xff] }
  0x80   : > { %v302_v44 = vpack.c.bf16 %v290_v43, %v289_v42  ;;  %v303_v47 = vpack.c.bf16 %v292_v46, %v291_v45  ;;  %v293_v48 = vld [vmem:[#allocation2 + $0x50] sm:$0xff]  ;;  %v294_v49 = vld [vmem:[#allocation2 + $0x58] sm:$0xff]  ;;  %v295_v51 = vld [vmem:[#allocation2 + $0x60] sm:$0xff] }
  0x81   : > { %408 = vmatpush1.bf16.msra.mxu0 %v1310_v22  ;;  %v304_v50 = vpack.c.bf16 %v294_v49, %v293_v48  ;;  %v296_v52 = vld [vmem:[#allocation2 + $0x68] sm:$0xff]  ;;  %v297_v54 = vld [vmem:[#allocation2 + $0x70] sm:$0xff]  ;;  %v298_v55 = vld [vmem:[#allocation2 + $0x78] sm:$0xff] }
  0x82   : > { %409 = vmatprep.subr.bf16.mxu0 %v1311_v23  ;;  %v305_v53 = vpack.c.bf16 %v296_v52, %v295_v51  ;;  %v306_v56 = vpack.c.bf16 %v298_v55, %v297_v54  ;;  %v1148_v54 = vld [vmem:[#allocation7] sm:$0xff]   ;;  %v1787_v55 = vld [vmem:[#allocation7 + $0x38] sm:$0xff]  }
  0x85   : > { %410 = vmatpush1.bf16.msra.mxu0 %v1313_v24 }
  0x86   : > { %411 = vmatprep.subr.bf16.mxu0 %v1314_v25 }
  0x89   : > { %412 = vmatpush1.bf16.msra.mxu0 %v1316_v26 }
  0x8a   : > { %413 = vmatprep.subr.bf16.mxu0 %v1317_v27 }
  0x8d   : > { %414 = vmatpush1.bf16.msra.mxu0 %v1319_v28 }
  0x8e   : > { %415 = vmatprep.subr.bf16.mxu0 %v1320_v29 }
  0x91   : > { %416 = vmatpush1.bf16.msra.mxu0 %v1322_v30 }
  0x92   : > { %417 = vmatprep.subr.bf16.mxu0 %v1323_v31 }
  0x95   : > { %418 = vmatpush1.bf16.msra.mxu0 %v1325_v32 }
  0x98   : > { %436 = vmatmul.mubr.bf16.vlgmr.msra.gmra.mrb[0].mxu0 %v299_v35 }
  0x99   : > { %445 = vmatprep.mubr.bf16.mxu0 %v1527_v18 }
  0xa0   : > { %446 = vmatmul.mubr.bf16.gmra.mrb[4].mxu0 %v300_v38 }
  0xa1   : > { %455 = vmatprep.mubr.bf16.mxu0 %v1527_v18 }
  0xa8   : > { %456 = vmatmul.mubr.bf16.gmra.mrb[8].mxu0 %v301_v41 }
  0xa9   : > { %465 = vmatprep.mubr.bf16.mxu0 %v1527_v18 }
  0xb0   : > { %466 = vmatmul.mubr.bf16.gmra.mrb[12].mxu0 %v302_v44  ;;  %v628_v44 = vlaneseq }
  0xb1   : > { %475 = vmatprep.mubr.bf16.mxu0 %v1527_v18 }
  0xb8   : > { %476 = vmatmul.mubr.bf16.gmra.mrb[16].mxu0 %v303_v47  ;;  %v629_v47 = vshrl.u32 %v628_v44, 7 }
  0xb9   : > { %485 = vmatprep.mubr.bf16.mxu0 %v1527_v18 }
  0xc0   : > { %486 = vmatmul.mubr.bf16.gmra.mrb[20].mxu0 %v304_v50  ;;  %v630_v50 = vsub.s32 0, %v629_v47  ;;  %v1182_v47 = vld [vmem:[#allocation7 + $0x20] sm:$0xff]  }
  0xc1   : > { %495 = vmatprep.mubr.bf16.mxu0 %v1527_v18 }
  0xc8   : > { %496 = vmatmul.mubr.bf16.gmra.mrb[24].mxu0 %v305_v53 }
  0xc9   : > { %505 = vmatprep.mubr.bf16.mxu0 %v1527_v18 }
  0xd0   : > { %506 = vmatmul.mubr.bf16.gmra.mrb[28].mxu0 %v306_v56 }
 0x16b   : > { %v437_v58 = vpop.f32.mrb[0].mxu0 }
 0x16c   : > { %v1759_v59 = vpop.f32.mrb[1].mxu0 }
 0x16d   : > { %550 = vperm.xlu0 %1300, %v1759_v59   ;;  %v441_v60 = vpop.f32.mrb[2].mxu0 }
 0x16e   : > { %v880_v61 = vpack.c.bf16 %v441_v60, %v437_v58  ;;  %v1762_v62 = vpop.f32.mrb[3].mxu0  ;;  %v1149_v60 = vunpack.c.l.bf16 %v1148_v54 }
 0x170   : > { %1202 = vmatprep.subr.bf16.mxu1 %v880_v61 }
 0x171   : > { %1203 = vmatpush3.bf16.msra.mxu1 %v880_v61  ;;  %555 = vperm.xlu0 %1300, %v1762_v62   ;;  %v1178_v61 = vunpack.c.h.bf16 %v1787_v55 }
 0x173   : > { %v447_v63 = vpop.f32.mrb[4].mxu0 }
 0x174   : > { %v1765_v0 = vpop.f32.mrb[5].mxu0 }
 0x175   : > { %560 = vperm.xlu1 %1301, %v1765_v0   ;;  %v451_v1 = vpop.f32.mrb[6].mxu0 }
 0x176   : > { %v881_v2 = vpack.c.bf16 %v451_v1, %v447_v63  ;;  %v453_v3 = vpop.f32.mrb[7].mxu0 }
 0x178   : > { %1204 = vmatprep.subr.bf16.mxu1 %v881_v2 }
 0x179   : > { %1205 = vmatpush3.bf16.msra.mxu1 %v881_v2  ;;  %565 = vperm.xlu1 %1301, %v453_v3  }
 0x17b   : > { %v457_v4 = vpop.f32.mrb[8].mxu0 }
 0x17c   : > { %v459_v5 = vpop.f32.mrb[9].mxu0 }
 0x17d   : > { %570 = vperm.xlu0 %1300, %v459_v5   ;;  %v461_v6 = vpop.f32.mrb[10].mxu0 }
 0x17e   : > { %v882_v7 = vpack.c.bf16 %v461_v6, %v457_v4  ;;  %v463_v8 = vpop.f32.mrb[11].mxu0  ;;  %v1150_v4 = vunpack.c.h.bf16 %v1148_v54 }
 0x17f   : > { %575 = vperm.xlu1 %1301, %v463_v8  }
 0x180   : > { %1206 = vmatprep.subr.bf16.mxu1 %v882_v7 }
 0x181   : > { %1207 = vmatpush3.bf16.msra.mxu1 %v882_v7 }
 0x183   : > { %v467_v9 = vpop.f32.mrb[12].mxu0 }
 0x184   : > { %v469_v10 = vpop.f32.mrb[13].mxu0 }
 0x185   : > { %580 = vperm.xlu0 %1300, %v469_v10   ;;  %v471_v11 = vpop.f32.mrb[14].mxu0 }
 0x186   : > { %v883_v12 = vpack.c.bf16 %v471_v11, %v467_v9  ;;  %v473_v13 = vpop.f32.mrb[15].mxu0 }
 0x187   : > { %585 = vperm.xlu1 %1301, %v473_v13  }
 0x188   : > { %1208 = vmatprep.subr.bf16.mxu1 %v883_v12 }
 0x189   : > { %1209 = vmatpush3.bf16.msra.mxu1 %v883_v12 }
 0x18b   : > { %v477_v14 = vpop.f32.mrb[16].mxu0 }
 0x18c   : > { %v479_v15 = vpop.f32.mrb[17].mxu0 }
 0x18d   : > { %590 = vperm.xlu0 %1300, %v479_v15   ;;  %v481_v16 = vpop.f32.mrb[18].mxu0 }
 0x18e   : > { %v884_v17 = vpack.c.bf16 %v481_v16, %v477_v14  ;;  %v483_v18 = vpop.f32.mrb[19].mxu0 }
 0x18f   : > { %595 = vperm.xlu1 %1301, %v483_v18  }
 0x190   : > { %1210 = vmatprep.subr.bf16.mxu1 %v884_v17 }
 0x191   : > { %1211 = vmatpush3.bf16.msra.mxu1 %v884_v17 }
 0x193   : > { %v487_v19 = vpop.f32.mrb[20].mxu0 }
 0x194   : > { %v489_v20 = vpop.f32.mrb[21].mxu0 }
 0x195   : > { %600 = vperm.xlu0 %1300, %v489_v20   ;;  %v491_v21 = vpop.f32.mrb[22].mxu0 }
 0x196   : > { %v885_v22 = vpack.c.bf16 %v491_v21, %v487_v19  ;;  %v493_v23 = vpop.f32.mrb[23].mxu0 }
 0x197   : > { %605 = vperm.xlu1 %1301, %v493_v23  }
 0x198   : > { %1212 = vmatprep.subr.bf16.mxu1 %v885_v22 }
 0x199   : > { %1213 = vmatpush3.bf16.msra.mxu1 %v885_v22 }
 0x19b   : > { %v497_v24 = vpop.f32.mrb[24].mxu0 }
 0x19c   : > { %v499_v25 = vpop.f32.mrb[25].mxu0 }
 0x19d   : > { %610 = vperm.xlu0 %1300, %v499_v25   ;;  %v501_v26 = vpop.f32.mrb[26].mxu0 }
 0x19e   : > { %v886_v27 = vpack.c.bf16 %v501_v26, %v497_v24  ;;  %v503_v28 = vpop.f32.mrb[27].mxu0 }
 0x19f   : > { %615 = vperm.xlu1 %1301, %v503_v28  }
 0x1a0   : > { %1214 = vmatprep.subr.bf16.mxu1 %v886_v27 }
 0x1a1   : > { %1215 = vmatpush3.bf16.msra.mxu1 %v886_v27 }
 0x1a3   : > { %v507_v29 = vpop.f32.mrb[28].mxu0 }
 0x1a4   : > { %v509_v30 = vpop.f32.mrb[29].mxu0 }
 0x1a5   : > { %620 = vperm.xlu0 %1300, %v509_v30   ;;  %v511_v31 = vpop.f32.mrb[30].mxu0 }
 0x1a6   : > { %v887_v32 = vpack.c.bf16 %v511_v31, %v507_v29  ;;  %v513_v33 = vpop.f32.mrb[31].mxu0  ;;  %v1181_v31 = vld [vmem:[#allocation7 + $0x18] sm:$0xff]  }
 0x1a7   : > { %625 = vperm.xlu1 %1301, %v513_v33  }
 0x1a8   : > { %1216 = vmatprep.subr.bf16.mxu1 %v887_v32 }
 0x1a9   : > { %1217 = vmatpush3.bf16.msra.mxu1 %v887_v32 }
 0x1c3   : > { %516 = vxpose.xlu0.b32.start [1/16] (narrow) %v1759_v59, 8 }
 0x1c7   : > { %517 = vxpose.xlu0.b32.cont [2/16] (narrow) %v1762_v62, 8 }
 0x1cb   : > { %518 = vxpose.xlu0.b32.cont [3/16] (narrow) %v1765_v0, 8 }
 0x1cf   : > { %519 = vxpose.xlu0.b32.cont [4/16] (narrow) %v453_v3, 8 }
 0x1d3   : > { %520 = vxpose.xlu0.b32.cont [5/16] (narrow) %v459_v5, 8 }
 0x1d7   : > { %521 = vxpose.xlu0.b32.cont [6/16] (narrow) %v463_v8, 8 }
 0x1db   : > { %522 = vxpose.xlu0.b32.cont [7/16] (narrow) %v469_v10, 8  ;;  %v1179_v10 = vld [vmem:[#allocation7 + $0x8] sm:$0xff]  }
 0x1dc   : > { %v1153_v11 = vunpack.c.l.bf16 %v1179_v10  ;;  %v1154_v16 = vunpack.c.h.bf16 %v1179_v10 }
 0x1df   : > { %523 = vxpose.xlu0.b32.cont [8/16] (narrow) %v473_v13, 8 }
 0x1e3   : > { %524 = vxpose.xlu0.b32.cont [9/16] (narrow) %v479_v15, 8 }
 0x1e7   : > { %525 = vxpose.xlu0.b32.cont [10/16] (narrow) %v483_v18, 8 }
 0x1eb   : > { %526 = vxpose.xlu0.b32.cont [11/16] (narrow) %v489_v20, 8  ;;  %v1180_v20 = vld [vmem:[#allocation7 + $0x10] sm:$0xff]  }
 0x1ec   : > { %v551_v34 = vpop.permute.xlu0 %550  ;;  %v1157_v22 = vunpack.c.l.bf16 %v1180_v20  ;;  %v1158_v27 = vunpack.c.h.bf16 %v1180_v20  ;;  %v1177_v20 = vunpack.c.l.bf16 %v1787_v55 }
 0x1ef   : > { %527 = vxpose.xlu0.b32.cont [12/16] (narrow) %v493_v23, 8 }
 0x1f0   : > { %v556_v35 = vpop.permute.xlu0 %555 }
 0x1f3   : > { %528 = vxpose.xlu0.b32.cont [13/16] (narrow) %v499_v25, 8 }
 0x1f4   : > { %v561_v36 = vpop.permute.xlu1 %560 }
 0x1f7   : > { %529 = vxpose.xlu0.b32.cont [14/16] (narrow) %v503_v28, 8 }
 0x1f8   : > { %v566_v38 = vpop.permute.xlu1 %565 }
 0x1fb   : > { %530 = vxpose.xlu0.b32.cont [15/16] (narrow) %v509_v30, 8 }
 0x1fc   : > { %v571_v37 = vpop.permute.xlu0 %570 }
 0x1fe   : > { %v576_v40 = vpop.permute.xlu1 %575 }
 0x1ff   : > { %531 = vxpose.xlu0.b32.end [16/16] (narrow) %v513_v33, 8  ;;  %v1161_v33 = vunpack.c.l.bf16 %v1181_v31 }
 0x204   : > { %v581_v39 = vpop.permute.xlu0 %580 }
 0x206   : > { %v586_v42 = vpop.permute.xlu1 %585 }
 0x20c   : > { %v1771_v41 = vpop.permute.xlu0 %590 }
 0x20e   : > { %v1775_v45 = vpop.permute.xlu1 %595 }
 0x214   : > { %v1773_v43 = vpop.permute.xlu0 %600 }
 0x216   : > { %v1779_v48 = vpop.permute.xlu1 %605 }
 0x21c   : > { %v1777_v46 = vpop.permute.xlu0 %610 }
 0x21e   : > { %v1783_v51 = vpop.permute.xlu1 %615 }
 0x224   : > { %v1781_v49 = vpop.permute.xlu0 %620 }
 0x226   : > { %v626_v56 = vpop.permute.xlu1 %625 }
 0x243   : > { %v532_v52 = vpop.trf.xlu0 }
 0x244   : > { %v1785_v53 = vrot.slane %v532_v52, %v630_v50  ;;  %v1165_v50 = vunpack.c.l.bf16 %v1182_v47 }
 0x246   : > { %v632_v57 = vadd.f32 %v1785_v53, %v551_v34  ;;  %v647_v58 = vadd.f32 %v1785_v53, %v626_v56  ;;  %v633_v59 = vadd.f32 %v1785_v53, %v556_v35  ;;  %v634_v1 = vadd.f32 %v1785_v53, %v561_v36 }
 0x247   : > { %v635_v5 = vadd.f32 %v1785_v53, %v566_v38  ;;  %v636_v15 = vadd.f32 %v1785_v53, %v571_v37  ;;  %v637_v21 = vadd.f32 %v1785_v53, %v576_v40  ;;  %v638_v26 = vadd.f32 %v1785_v53, %v581_v39 }
 0x248   : > { %v648_v62 = vmul.f32 0.2, %v632_v57  ;;  %v663_v63 = vmul.f32 0.2, %v647_v58  ;;  %v649_v0 = vmul.f32 0.2, %v633_v59  ;;  %v639_v32 = vadd.f32 %v1785_v53, %v586_v42 }
 0x249   : > { %v650_v9 = vmul.f32 0.2, %v634_v1  ;;  %v651_v14 = vmul.f32 0.2, %v635_v5  ;;  %v652_v19 = vmul.f32 0.2, %v636_v15  ;;  %v640_v37 = vadd.f32 %v1785_v53, %v1771_v41 }
 0x24a   : > { %v664_v2 = vmax.f32 %v632_v57, %v648_v62  ;;  %v679_v3 = vmax.f32 %v647_v58, %v663_v63  ;;  %v665_v8 = vmax.f32 %v633_v59, %v649_v0  ;;  %v653_v25 = vmul.f32 0.2, %v637_v21 }
 0x24b   : > { %v666_v13 = vmax.f32 %v634_v1, %v650_v9  ;;  %v667_v18 = vmax.f32 %v635_v5, %v651_v14  ;;  %v668_v24 = vmax.f32 %v636_v15, %v652_v19  ;;  %v654_v30 = vmul.f32 0.2, %v638_v26 }
 0x24c   : > { %v1795_v6 = vadd.f32 %v1149_v60, %v664_v2  ;;  %v1797_v7 = vadd.f32 %v1178_v61, %v679_v3  ;;  %v1801_v12 = vadd.f32 %v1150_v4, %v665_v8  ;;  %v669_v29 = vmax.f32 %v637_v21, %v653_v25  ;;  %v1183_v61 = vld [vmem:[#allocation7 + $0x28] sm:$0xff]   ;;  %v1184_v8 = vld [vmem:[#allocation7 + $0x30] sm:$0xff]  }
 0x24d   : > { %v1805_v17 = vadd.f32 %v1153_v11, %v666_v13  ;;  %v1809_v23 = vadd.f32 %v1154_v16, %v667_v18  ;;  %v1813_v28 = vadd.f32 %v1157_v22, %v668_v24  ;;  %v670_v35 = vmax.f32 %v638_v26, %v654_v30 }
 0x24e   : > { %728 = vmax.xlane.f32.xlu1 %v1795_v6  ;;  %758 = vmax.xlane.f32.xlu0 %v1797_v7  ;;  %v1817_v34 = vadd.f32 %v1158_v27, %v669_v29  ;;  %v655_v36 = vmul.f32 0.2, %v639_v32  ;;  %v1162_v38 = vunpack.c.h.bf16 %v1181_v31  ;;  %v656_v44 = vmul.f32 0.2, %v640_v37 }
 0x24f   : > { %v1822_v39 = vadd.f32 %v1161_v33, %v670_v35  ;;  %v641_v42 = vadd.f32 %v1785_v53, %v1775_v45  ;;  %v642_v41 = vadd.f32 %v1785_v53, %v1773_v43  ;;  %v1166_v57 = vunpack.c.h.bf16 %v1182_v47 }
 0x250   : > { %v671_v40 = vmax.f32 %v639_v32, %v655_v36  ;;  %v672_v54 = vmax.f32 %v640_v37, %v656_v44  ;;  %v643_v45 = vadd.f32 %v1785_v53, %v1779_v48  ;;  %v1169_v62 = vunpack.c.l.bf16 %v1183_v61 }
 0x251   : > { %v657_v56 = vmul.f32 0.2, %v641_v42  ;;  %v658_v60 = vmul.f32 0.2, %v642_v41  ;;  %v644_v43 = vadd.f32 %v1785_v53, %v1777_v46  ;;  %v1170_v2 = vunpack.c.h.bf16 %v1183_v61 }
 0x252   : > { %730 = vmax.xlane.f32.xlu1 %v1801_v12  ;;  %v1827_v52 = vadd.f32 %v1162_v38, %v671_v40  ;;  %v1832_v58 = vadd.f32 %v1165_v50, %v672_v54  ;;  %v659_v1 = vmul.f32 0.2, %v643_v45  ;;  %v645_v48 = vadd.f32 %v1785_v53, %v1783_v51 }
 0x253   : > { %v673_v59 = vmax.f32 %v641_v42, %v657_v56  ;;  %v674_v0 = vmax.f32 %v642_v41, %v658_v60  ;;  %v660_v5 = vmul.f32 0.2, %v644_v43  ;;  %v1173_v9 = vunpack.c.l.bf16 %v1184_v8 }
 0x254   : > { %v675_v4 = vmax.f32 %v643_v45, %v659_v1  ;;  %v661_v13 = vmul.f32 0.2, %v645_v48  ;;  %v646_v46 = vadd.f32 %v1785_v53, %v1781_v49  ;;  %v1174_v16 = vunpack.c.h.bf16 %v1184_v8 }
 0x255   : > { %v1837_v63 = vadd.f32 %v1166_v57, %v673_v59  ;;  %v1842_v3 = vadd.f32 %v1169_v62, %v674_v0  ;;  %v676_v11 = vmax.f32 %v644_v43, %v660_v5 }
 0x256   : > { %732 = vmax.xlane.f32.xlu1 %v1805_v17  ;;  %v1847_v10 = vadd.f32 %v1170_v2, %v675_v4  ;;  %v677_v15 = vmax.f32 %v645_v48, %v661_v13  ;;  %v662_v18 = vmul.f32 0.2, %v646_v46 }
 0x257   : > { %v1852_v14 = vadd.f32 %v1173_v9, %v676_v11 }
 0x258   : > { %v1855_v51 = vadd.f32 %v1174_v16, %v677_v15  ;;  %v678_v19 = vmax.f32 %v646_v46, %v662_v18 }
 0x25a   : > { %734 = vmax.xlane.f32.xlu1 %v1809_v23  ;;  %v1859_v21 = vadd.f32 %v1177_v20, %v678_v19 }
 0x25e   : > { %736 = vmax.xlane.f32.xlu1 %v1813_v28 }
 0x262   : > { %738 = vmax.xlane.f32.xlu1 %v1817_v34 }
 0x266   : > { %740 = vmax.xlane.f32.xlu1 %v1822_v39 }
 0x26a   : > { %742 = vmax.xlane.f32.xlu1 %v1827_v52 }
 0x26e   : > { %744 = vmax.xlane.f32.xlu1 %v1832_v58 }
 0x272   : > { %746 = vmax.xlane.f32.xlu1 %v1837_v63 }
 0x276   : > { %748 = vmax.xlane.f32.xlu1 %v1842_v3 }
 0x27a   : > { %750 = vmax.xlane.f32.xlu1 %v1847_v10 }
 0x27e   : > { %752 = vmax.xlane.f32.xlu1 %v1852_v14 }
 0x282   : > { %754 = vmax.xlane.f32.xlu1 %v1855_v51 }
 0x286   : > { %756 = vmax.xlane.f32.xlu1 %v1859_v21 }
 0x2db   : > { %v729_v49 = vpop.xlane.xlu1 %728  ;;  %v759_v5 = vpop.xlane.xlu0 %758 }
 0x2dc   : > { %v760_v53 = vsub.f32 %v1795_v6, %v729_v49  ;;  %v775_v9 = vsub.f32 %v1797_v7, %v759_v5 }
 0x2de   : > { %v776_v22 = vmul.f32 1.442695, %v760_v53  ;;  %v806_v15 = vmul.f32 1.442695, %v775_v9 }
 0x2df   : > { %v731_v24 = vpop.xlane.xlu1 %730 }
 0x2e0   : > { %v761_v25 = vsub.f32 %v1801_v12, %v731_v24  ;;  %1326 = vpow2.f32 %v776_v22 }
 0x2e2   : > { %v778_v26 = vmul.f32 1.442695, %v761_v25 }
 0x2e3   : > { %v733_v27 = vpop.xlane.xlu1 %732 }
 0x2e4   : > { %1328 = vpow2.f32 %v778_v26  ;;  %v762_v29 = vsub.f32 %v1805_v17, %v733_v27 }
 0x2e6   : > { %v780_v55 = vmul.f32 1.442695, %v762_v29 }
 0x2e7   : > { %v735_v30 = vpop.xlane.xlu1 %734 }
 0x2e8   : > { %1330 = vpow2.f32 %v780_v55  ;;  %v763_v31 = vsub.f32 %v1809_v23, %v735_v30 }
 0x2ea   : > { %v782_v32 = vmul.f32 1.442695, %v763_v31  ;;  %v1866_v33 = vpop.eup %1326 }
 0x2eb   : > { %v737_v35 = vpop.xlane.xlu1 %736  ;;  %808 = vadd.xlane.f32.xlu1 %v1866_v33 }
 0x2ec   : > { %1332 = vpow2.f32 %v782_v32  ;;  %v764_v6 = vsub.f32 %v1813_v28, %v737_v35 }
 0x2ee   : > { %v1870_v12 = vpop.eup %1328  ;;  %v784_v36 = vmul.f32 1.442695, %v764_v6 }
 0x2ef   : > { %v739_v37 = vpop.xlane.xlu1 %738  ;;  %810 = vadd.xlane.f32.xlu1 %v1870_v12 }
 0x2f0   : > { %1334 = vpow2.f32 %v784_v36  ;;  %v765_v17 = vsub.f32 %v1817_v34, %v739_v37 }
 0x2f2   : > { %v1874_v38 = vpop.eup %1330  ;;  %v786_v23 = vmul.f32 1.442695, %v765_v17 }
 0x2f3   : > { %v741_v40 = vpop.xlane.xlu1 %740  ;;  %812 = vadd.xlane.f32.xlu1 %v1874_v38 }
 0x2f4   : > { %1336 = vpow2.f32 %v786_v23  ;;  %v766_v44 = vsub.f32 %v1822_v39, %v741_v40 }
 0x2f6   : > { %v1878_v47 = vpop.eup %1332  ;;  %v788_v28 = vmul.f32 1.442695, %v766_v44 }
 0x2f7   : > { %v743_v42 = vpop.xlane.xlu1 %742  ;;  %814 = vadd.xlane.f32.xlu1 %v1878_v47 }
 0x2f8   : > { %1338 = vpow2.f32 %v788_v28  ;;  %v767_v50 = vsub.f32 %v1827_v52, %v743_v42 }
 0x2fa   : > { %v1882_v54 = vpop.eup %1334  ;;  %v790_v34 = vmul.f32 1.442695, %v767_v50 }
 0x2fb   : > { %v745_v56 = vpop.xlane.xlu1 %744  ;;  %816 = vadd.xlane.f32.xlu1 %v1882_v54 }
 0x2fc   : > { %1340 = vpow2.f32 %v790_v34  ;;  %v768_v41 = vsub.f32 %v1832_v58, %v745_v56 }
 0x2fe   : > { %v1886_v57 = vpop.eup %1336  ;;  %v792_v39 = vmul.f32 1.442695, %v768_v41 }
 0x2ff   : > { %v747_v59 = vpop.xlane.xlu1 %746  ;;  %818 = vadd.xlane.f32.xlu1 %v1886_v57 }
 0x300   : > { %1342 = vpow2.f32 %v792_v39  ;;  %v769_v60 = vsub.f32 %v1837_v63, %v747_v59 }
 0x302   : > { %v1890_v61 = vpop.eup %1338  ;;  %v794_v52 = vmul.f32 1.442695, %v769_v60 }
 0x303   : > { %v749_v45 = vpop.xlane.xlu1 %748  ;;  %820 = vadd.xlane.f32.xlu1 %v1890_v61 }
 0x304   : > { %1344 = vpow2.f32 %v794_v52  ;;  %v770_v62 = vsub.f32 %v1842_v3, %v749_v45 }
 0x306   : > { %v1894_v0 = vpop.eup %1340  ;;  %v796_v58 = vmul.f32 1.442695, %v770_v62 }
 0x307   : > { %v751_v1 = vpop.xlane.xlu1 %750  ;;  %822 = vadd.xlane.f32.xlu1 %v1894_v0 }
 0x308   : > { %1346 = vpow2.f32 %v796_v58  ;;  %v771_v43 = vsub.f32 %v1847_v10, %v751_v1 }
 0x30a   : > { %v1898_v2 = vpop.eup %1342  ;;  %v798_v63 = vmul.f32 1.442695, %v771_v43 }
 0x30b   : > { %v753_v4 = vpop.xlane.xlu1 %752  ;;  %824 = vadd.xlane.f32.xlu1 %v1898_v2 }
 0x30c   : > { %1348 = vpow2.f32 %v798_v63  ;;  %v772_v8 = vsub.f32 %v1852_v14, %v753_v4 }
 0x30e   : > { %v1902_v3 = vpop.eup %1344  ;;  %v800_v48 = vmul.f32 1.442695, %v772_v8 }
 0x30f   : > { %v755_v11 = vpop.xlane.xlu1 %754  ;;  %826 = vadd.xlane.f32.xlu1 %v1902_v3 }
 0x310   : > { %1350 = vpow2.f32 %v800_v48  ;;  %v773_v10 = vsub.f32 %v1855_v51, %v755_v11 }
 0x312   : > { %v1907_v13 = vpop.eup %1346  ;;  %v802_v46 = vmul.f32 1.442695, %v773_v10 }
 0x313   : > { %v757_v16 = vpop.xlane.xlu1 %756  ;;  %828 = vadd.xlane.f32.xlu1 %v1907_v13 }
 0x314   : > { %1352 = vpow2.f32 %v802_v46  ;;  %v774_v14 = vsub.f32 %v1859_v21, %v757_v16  ;;  %v1142_v16 = vld [vmem:[%s245_s7] ss:$0 sm:$0xff] }
 0x315   : > { %1354 = vpow2.f32 %v806_v15 }
 0x316   : > { %v1911_v18 = vpop.eup %1348  ;;  %v804_v19 = vmul.f32 1.442695, %v774_v14 }
 0x317   : > { %830 = vadd.xlane.f32.xlu0 %v1911_v18 }
 0x318   : > { %1356 = vpow2.f32 %v804_v19 }
 0x31a   : > { %v1914_v7 = vpop.eup %1350 }
 0x31b   : > { %832 = vadd.xlane.f32.xlu1 %v1914_v7 }
 0x31e   : > { %v1917_v51 = vpop.eup %1352 }
 0x31f   : > { %834 = vadd.xlane.f32.xlu0 %v1917_v51  ;;  %v1920_v20 = vpop.eup %1354 }
 0x322   : > { %v1922_v49 = vpop.eup %1356 }
 0x323   : > { %838 = vadd.xlane.f32.xlu0 %v1920_v20  ;;  %836 = vadd.xlane.f32.xlu1 %v1922_v49 }
 0x378   : > { %v809_v21 = vpop.xlane.xlu1 %808 }
 0x379   : > { %1358 = vrcp.f32 %v809_v21 }
 0x37c   : > { %v811_v53 = vpop.xlane.xlu1 %810 }
 0x37d   : > { %1360 = vrcp.f32 %v811_v53 }
 0x380   : > { %v813_v22 = vpop.xlane.xlu1 %812 }
 0x381   : > { %1362 = vrcp.f32 %v813_v22 }
 0x383   : > { %v1359_v25 = vpop.eup %1358 }
 0x384   : > { %v815_v24 = vpop.xlane.xlu1 %814  ;;  %v856_v29 = vmul.f32 %v1359_v25, %v1866_v33 }
 0x385   : > { %1364 = vrcp.f32 %v815_v24 }
 0x387   : > { %v1361_v26 = vpop.eup %1360 }
 0x388   : > { %v817_v27 = vpop.xlane.xlu1 %816  ;;  %v857_v55 = vmul.f32 %v1361_v26, %v1870_v12 }
 0x389   : > { %1366 = vrcp.f32 %v817_v27 }
 0x38a   : > { %v872_v30 = vpack.c.bf16 %v857_v55, %v856_v29 }
 0x38b   : > { %v1363_v32 = vpop.eup %1362 }
 0x38c   : > { %1218 = vmatprep.mubr.bf16.mxu1 %v872_v30  ;;  %v819_v31 = vpop.xlane.xlu1 %818  ;;  %v858_v36 = vmul.f32 %v1363_v32, %v1874_v38 }
 0x38d   : > { %1368 = vrcp.f32 %v819_v31 }
 0x38f   : > { %v1365_v35 = vpop.eup %1364 }
 0x390   : > { %v821_v6 = vpop.xlane.xlu1 %820  ;;  %v859_v37 = vmul.f32 %v1365_v35, %v1878_v47 }
 0x391   : > { %1370 = vrcp.f32 %v821_v6 }
 0x392   : > { %v873_v17 = vpack.c.bf16 %v859_v37, %v858_v36 }
 0x393   : > { %v1367_v40 = vpop.eup %1366 }
 0x394   : > { %1219 = vmatmul.mubr.bf16.vlgmr.msra.gmra.mrb[0].mxu1 %v873_v17  ;;  %v823_v23 = vpop.xlane.xlu1 %822  ;;  %v860_v44 = vmul.f32 %v1367_v40, %v1882_v54 }
 0x395   : > { %1372 = vrcp.f32 %v823_v23 }
 0x397   : > { %v1369_v33 = vpop.eup %1368 }
 0x398   : > { %v825_v12 = vpop.xlane.xlu1 %824  ;;  %v861_v28 = vmul.f32 %v1369_v33, %v1886_v57 }
 0x399   : > { %1374 = vrcp.f32 %v825_v12 }
 0x39a   : > { %v874_v42 = vpack.c.bf16 %v861_v28, %v860_v44 }
 0x39b   : > { %v1371_v34 = vpop.eup %1370 }
 0x39c   : > { %1222 = vmatprep.mubr.bf16.mxu1 %v874_v42  ;;  %v827_v50 = vpop.xlane.xlu1 %826  ;;  %v862_v56 = vmul.f32 %v1371_v34, %v1890_v61 }
 0x39d   : > { %1376 = vrcp.f32 %v827_v50 }
 0x39f   : > { %v1373_v38 = vpop.eup %1372 }
 0x3a0   : > { %v829_v47 = vpop.xlane.xlu1 %828  ;;  %v863_v41 = vmul.f32 %v1373_v38, %v1894_v0 }
 0x3a1   : > { %1378 = vrcp.f32 %v829_v47 }
 0x3a2   : > { %v875_v39 = vpack.c.bf16 %v863_v41, %v862_v56 }
 0x3a3   : > { %v1375_v54 = vpop.eup %1374 }
 0x3a4   : > { %v831_v59 = vpop.xlane.xlu0 %830  ;;  %1223 = vmatmul.mubr.bf16.gmra.mrb[4].mxu1 %v875_v39  ;;  %v864_v52 = vmul.f32 %v1375_v54, %v1898_v2 }
 0x3a5   : > { %1380 = vrcp.f32 %v831_v59 }
 0x3a7   : > { %v1377_v60 = vpop.eup %1376 }
 0x3a8   : > { %v833_v57 = vpop.xlane.xlu1 %832  ;;  %v865_v45 = vmul.f32 %v1377_v60, %v1902_v3 }
 0x3a9   : > { %1382 = vrcp.f32 %v833_v57 }
 0x3aa   : > { %v876_v62 = vpack.c.bf16 %v865_v45, %v864_v52 }
 0x3ab   : > { %v1379_v1 = vpop.eup %1378 }
 0x3ac   : > { %v835_v58 = vpop.xlane.xlu0 %834  ;;  %1226 = vmatprep.mubr.bf16.mxu1 %v876_v62  ;;  %v866_v63 = vmul.f32 %v1379_v1, %v1907_v13 }
 0x3ad   : > { %1384 = vrcp.f32 %v835_v58 }
 0x3af   : > { %v1381_v61 = vpop.eup %1380 }
 0x3b0   : > { %v839_v0 = vpop.xlane.xlu0 %838  ;;  %v837_v43 = vpop.xlane.xlu1 %836  ;;  %v867_v4 = vmul.f32 %v1381_v61, %v1911_v18 }
 0x3b1   : > { %1386 = vrcp.f32 %v839_v0 }
 0x3b2   : > { %1388 = vrcp.f32 %v837_v43  ;;  %v877_v5 = vpack.c.bf16 %v867_v4, %v866_v63 }
 0x3b3   : > { %v1383_v2 = vpop.eup %1382 }
 0x3b4   : > { %1227 = vmatmul.mubr.bf16.gmra.mrb[8].mxu1 %v877_v5  ;;  %v868_v3 = vmul.f32 %v1383_v2, %v1914_v7 }
 0x3b7   : > { %v1385_v8 = vpop.eup %1384 }
 0x3b8   : > { %v869_v48 = vmul.f32 %v1385_v8, %v1917_v51 }
 0x3ba   : > { %v878_v9 = vpack.c.bf16 %v869_v48, %v868_v3 }
 0x3bb   : > { %v1387_v11 = vpop.eup %1386 }
 0x3bc   : > { %v1389_v10 = vpop.eup %1388  ;;  %1230 = vmatprep.mubr.bf16.mxu1 %v878_v9  ;;  %v871_v46 = vmul.f32 %v1387_v11, %v1920_v20 }
 0x3bd   : > { %v870_v13 = vmul.f32 %v1389_v10, %v1922_v49 }
 0x3bf   : > { %v879_v15 = vpack.c.bf16 %v871_v46, %v870_v13 }
 0x3c1   : > { %1231 = vmatmul.mubr.bf16.gmra.mrb[12].mxu1 %v879_v15 }
 0x467   : > { %v1220_v14 = vpop.f32.mrb[0].mxu1 }
 0x468   : > { %v1947_v18 = vadd.f32 %v1220_v14, %v1142_v16  ;;  %v929_v19 = vpop.f32.mrb[1].mxu1 }
 0x469   : > { %v1949_v7 = vadd.f32 %v1142_v16, %v929_v19  ;;  %v1221_v51 = vpop.f32.mrb[2].mxu1 }
 0x46a   : > { %v994_v21 = vmax.f32 %v1947_v18, 0.0  ;;  %v1952_v53 = vadd.f32 %v1221_v51, %v1142_v16  ;;  %v932_v20 = vpop.f32.mrb[3].mxu1 }
 0x46b   : > { %v992_v49 = vmax.f32 %v1949_v7, 0.0  ;;  %v933_v22 = vadd.f32 %v1142_v16, %v932_v20 }
 0x46c   : > { %1010 = vst [vmem:[#allocation2 + $0x10] sm:$0xff] %v994_v21  ;;  %v995_v24 = vmax.f32 %v1952_v53, 0.0  ;;  %1030 = vst [vmem:[%s2022_s4 + $0x10] sm:$0xff] (!%p1143_p11), %v994_v21 }
 0x46d   : > { %1008 = vst [vmem:[#allocation2] sm:$0xff] %v992_v49  ;;  %v993_v25 = vmax.f32 %v933_v22, 0.0  ;;  %1028 = vst [vmem:[%s2022_s4] sm:$0xff] (!%p1143_p11), %v992_v49 }
 0x46e   : > { %1011 = vst [vmem:[#allocation2 + $0x18] sm:$0xff] %v995_v24  ;;  %1031 = vst [vmem:[%s2022_s4 + $0x18] sm:$0xff] (!%p1143_p11), %v995_v24 }
 0x46f   : > { %1009 = vst [vmem:[#allocation2 + $0x8] sm:$0xff] %v993_v25  ;;  %1029 = vst [vmem:[%s2022_s4 + $0x8] sm:$0xff] (!%p1143_p11), %v993_v25 }
 0x477   : > { %v1224_v26 = vpop.f32.mrb[4].mxu1 }
 0x478   : > { %v954_v27 = vadd.f32 %v1224_v26, %v1142_v16  ;;  %v945_v29 = vpop.f32.mrb[5].mxu1 }
 0x479   : > { %v946_v55 = vadd.f32 %v1142_v16, %v945_v29  ;;  %v1225_v30 = vpop.f32.mrb[6].mxu1 }
 0x47a   : > { %v998_v31 = vmax.f32 %v954_v27, 0.0  ;;  %v957_v32 = vadd.f32 %v1225_v30, %v1142_v16  ;;  %v948_v35 = vpop.f32.mrb[7].mxu1 }
 0x47b   : > { %v996_v6 = vmax.f32 %v946_v55, 0.0  ;;  %v949_v36 = vadd.f32 %v1142_v16, %v948_v35 }
 0x47c   : > { %1014 = vst [vmem:[#allocation2 + $0x30] sm:$0xff] %v998_v31  ;;  %v999_v37 = vmax.f32 %v957_v32, 0.0  ;;  %1034 = vst [vmem:[%s2022_s4 + $0x30] sm:$0xff] (!%p1143_p11), %v998_v31 }
 0x47d   : > { %1012 = vst [vmem:[#allocation2 + $0x20] sm:$0xff] %v996_v6  ;;  %v997_v17 = vmax.f32 %v949_v36, 0.0  ;;  %1032 = vst [vmem:[%s2022_s4 + $0x20] sm:$0xff] (!%p1143_p11), %v996_v6 }
 0x47e   : > { %1015 = vst [vmem:[#allocation2 + $0x38] sm:$0xff] %v999_v37  ;;  %1035 = vst [vmem:[%s2022_s4 + $0x38] sm:$0xff] (!%p1143_p11), %v999_v37 }
 0x47f   : > { %1013 = vst [vmem:[#allocation2 + $0x28] sm:$0xff] %v997_v17  ;;  %1033 = vst [vmem:[%s2022_s4 + $0x28] sm:$0xff] (!%p1143_p11), %v997_v17 }
 0x487   : > { %v1228_v23 = vpop.f32.mrb[8].mxu1 }
 0x488   : > { %v970_v40 = vadd.f32 %v1228_v23, %v1142_v16  ;;  %v961_v33 = vpop.f32.mrb[9].mxu1 }
 0x489   : > { %v962_v12 = vadd.f32 %v1142_v16, %v961_v33  ;;  %v1229_v44 = vpop.f32.mrb[10].mxu1 }
 0x48a   : > { %v1002_v28 = vmax.f32 %v970_v40, 0.0  ;;  %v973_v42 = vadd.f32 %v1229_v44, %v1142_v16  ;;  %v964_v50 = vpop.f32.mrb[11].mxu1 }
 0x48b   : > { %v1000_v34 = vmax.f32 %v962_v12, 0.0  ;;  %v965_v38 = vadd.f32 %v1142_v16, %v964_v50 }
 0x48c   : > { %1018 = vst [vmem:[#allocation2 + $0x50] sm:$0xff] %v1002_v28  ;;  %v1003_v47 = vmax.f32 %v973_v42, 0.0  ;;  %1038 = vst [vmem:[%s2022_s4 + $0x50] sm:$0xff] (!%p1143_p11), %v1002_v28 }
 0x48d   : > { %1016 = vst [vmem:[#allocation2 + $0x40] sm:$0xff] %v1000_v34  ;;  %v1001_v56 = vmax.f32 %v965_v38, 0.0  ;;  %1036 = vst [vmem:[%s2022_s4 + $0x40] sm:$0xff] (!%p1143_p11), %v1000_v34 }
 0x48e   : > { %1019 = vst [vmem:[#allocation2 + $0x58] sm:$0xff] %v1003_v47  ;;  %1039 = vst [vmem:[%s2022_s4 + $0x58] sm:$0xff] (!%p1143_p11), %v1003_v47 }
 0x48f   : > { %1017 = vst [vmem:[#allocation2 + $0x48] sm:$0xff] %v1001_v56  ;;  %1037 = vst [vmem:[%s2022_s4 + $0x48] sm:$0xff] (!%p1143_p11), %v1001_v56 }
 0x494   : > { %v1232_v41 = vpop.f32.mrb[12].mxu1 }
 0x495   : > { %v986_v39 = vadd.f32 %v1232_v41, %v1142_v16  ;;  %v977_v59 = vpop.f32.mrb[13].mxu1 }
 0x496   : > { %v978_v54 = vadd.f32 %v1142_v16, %v977_v59  ;;  %v1233_v60 = vpop.f32.mrb[14].mxu1  ;;  %1027 = sbr.rel (%p1143_p11) target bundleno = 1181 (0x49d), region = 56 }
 0x497   : > { %v1006_v57 = vmax.f32 %v986_v39, 0.0  ;;  %v989_v52 = vadd.f32 %v1233_v60, %v1142_v16  ;;  %v980_v45 = vpop.f32.mrb[15].mxu1 }
 0x498   : > { %v1004_v62 = vmax.f32 %v978_v54, 0.0  ;;  %v981_v58 = vadd.f32 %v1142_v16, %v980_v45 }
 0x499   : > { %1022 = vst [vmem:[#allocation2 + $0x70] sm:$0xff] %v1006_v57  ;;  %v1007_v1 = vmax.f32 %v989_v52, 0.0  ;;  %1042 = vst [vmem:[%s2022_s4 + $0x70] sm:$0xff] (!%p1143_p11), %v1006_v57 }
 0x49a   : > { %1020 = vst [vmem:[#allocation2 + $0x60] sm:$0xff] %v1004_v62  ;;  %v1005_v61 = vmax.f32 %v981_v58, 0.0  ;;  %1040 = vst [vmem:[%s2022_s4 + $0x60] sm:$0xff] (!%p1143_p11), %v1004_v62 }
 0x49b   : > { %1023 = vst [vmem:[#allocation2 + $0x78] sm:$0xff] %v1007_v1  ;;  %1043 = vst [vmem:[%s2022_s4 + $0x78] sm:$0xff] (!%p1143_p11), %v1007_v1 }
 0x49c   : > { %1021 = vst [vmem:[#allocation2 + $0x68] sm:$0xff] %v1005_v61  ;;  %1041 = vst [vmem:[%s2022_s4 + $0x68] sm:$0xff] (!%p1143_p11), %v1005_v61 }
 0x49d PF: > { %p15_p13 = scmp.ge.s32.totalorder %s1576_s20, 5   ;;  %s2040_s15 = smov %s1510_s16 }
 0x49e   : > { %s2041_s16 = smov %s1514_s17  ;;  %s2042_s17 = smov %s1586_s23 }
 0x49f   : > { %s2043_s18 = smov %s1576_s20  ;;  %17 = sbr.rel (!%p15_p13) target bundleno = 4 (0x4), region = 92 }
 0x4a6   :  { %1055 = vsyncpa [#allocation4], 1 }
 0x4a7   :  { %1057 = vsyncpa [#allocation4 + $0x1], 1 }
 0x4a8   :  { %1058 = vsyncpa [#allocation6], 1 }
 0x4a9   :  { %1060 = vsyncpa [#allocation6 + $0x1], 1 }

</bundles_post_ra>
